<compile_context>
chip_gen: v6e
topology: v6e:2x2x1
jax: 0.10.0
libtpu: 0.0.40
codegen_flags: <defaults>
</compile_context>

<pallas_src>
import functools

import jax
import jax.numpy as jnp
from jax.experimental import pallas as pl
from jax.experimental.pallas import tpu as pltpu


def _round_up(x, m):
    return ((x + m - 1) // m) * m


@functools.lru_cache(maxsize=None)
def _act_prologue_in_bf16():
    """bf16 activation prologue on chips with bf16 VALUs (v6e/v7x); f32 on v5e-."""
    try:
        kind = jax.devices()[0].device_kind.lower()
    except Exception:
        return False
    return not any(v in kind for v in ("v2", "v3", "v4", "v5"))


# ---------------- fused matmul Pallas kernel ----------------

def _fused_matmul_kernel(a_ref, b_ref, scale_ref, shift_ref, o_ref, *,
                         in_act, out_act, act_in_bf16):
    # a_ref: (tm, K) bf16 ; b_ref: (K, tn) bf16 ; scale/shift: (1, tn) f32
    a = a_ref[...]
    if in_act != "none":
        if act_in_bf16:                        # bf16 VALU path (v6e/v7x)
            if in_act == "leaky_relu":
                a = jnp.where(a >= 0, a, 0.2 * a)
            else:                              # relu
                a = jnp.maximum(a, 0.0)
        else:                                  # f32 path (v5e has no bf16 VALU)
            af = a.astype(jnp.float32)
            if in_act == "leaky_relu":
                af = jnp.where(af >= 0, af, 0.2 * af)
            else:
                af = jnp.maximum(af, 0.0)
            a = af.astype(jnp.bfloat16)
    acc = jnp.dot(a, b_ref[...], preferred_element_type=jnp.float32)
    y = acc * scale_ref[...] + shift_ref[...]
    if out_act == "tanh":
        y = jnp.tanh(y)
    o_ref[...] = y.astype(o_ref.dtype)         # bf16 store (half the writeback)


def fused_matmul(a, b, scale, shift, in_act="none", out_act="none"):
    """out = act_out(act_in(a) @ b * scale + shift), stored in bf16.

    a: (M, K) bf16, b: (K, Np) bf16 with Np a multiple of 128,
    scale/shift: (Np,) f32.  Returns (M, Np) bf16.
    """
    M, K = a.shape
    _, Np = b.shape
    assert Np % 128 == 0
    # Adaptive M tile: cap 256 so the heavy outermost layers keep >=2 parallel
    # grid steps (v7x dual TensorCores); tiny inner levels are not padded up.
    tm = min(256, _round_up(M, 16))
    Mp = _round_up(M, tm)
    tn = 256 if Np % 256 == 0 else 128         # wider N tile when it fits (v6e/v7x MXU)
    if Mp != M:
        a = jnp.pad(a, ((0, Mp - M), (0, 0)))
    cost = pl.CostEstimate(
        flops=2 * Mp * K * Np,
        transcendentals=Mp * Np if out_act == "tanh" else 0,
        bytes_accessed=2 * Mp * K + 2 * K * Np + 2 * Mp * Np + 8 * Np)
    out = pl.pallas_call(
        functools.partial(_fused_matmul_kernel, in_act=in_act, out_act=out_act,
                          act_in_bf16=_act_prologue_in_bf16()),
        out_shape=jax.ShapeDtypeStruct((Mp, Np), jnp.bfloat16),
        grid=(Mp // tm, Np // tn),
        in_specs=[
            pl.BlockSpec((tm, K), lambda i, j: (i, 0)),
            pl.BlockSpec((K, tn), lambda i, j: (0, j)),
            pl.BlockSpec((1, tn), lambda i, j: (0, j)),
            pl.BlockSpec((1, tn), lambda i, j: (0, j)),
        ],
        out_specs=pl.BlockSpec((tm, tn), lambda i, j: (i, j)),
        compiler_params=pltpu.CompilerParams(
            dimension_semantics=("parallel", "parallel")),
        cost_estimate=cost,
    )(a, b, scale.reshape(1, Np), shift.reshape(1, Np))
    return out[:M, :]


# ---------------- conv lowering (im2col glue + fused Pallas matmul) ----------------

def _fold_affine(cout, bias, bn):
    """Fold Conv bias + eval-mode BatchNorm into a per-channel scale/shift."""
    # TODO(synk): train-mode BatchNorm (batch statistics) not implemented;
    # running stats (eval mode) are folded into the matmul epilogue.
    if bn is not None:
        scale = bn["gamma"] / jnp.sqrt(bn["var"] + 1e-5)
        shift = bn["beta"] - bn["mean"] * scale
        if bias is not None:
            shift = shift + bias * scale
    else:
        scale = jnp.ones((cout,), jnp.float32)
        shift = bias if bias is not None else jnp.zeros((cout,), jnp.float32)
    return scale, shift


def conv2d_s2(x, p, bn=None, in_act="none", out_act="none"):
    """PyTorch Conv2d(Cin, Cout, 4, stride=2, padding=1), NHWC, fused epilogue."""
    w = p["w"]                                 # (Cout, Cin, 4, 4)
    Cout, Cin = w.shape[0], w.shape[1]
    Np = _round_up(Cout, 128)                  # lane-dense output, sliced below
    scale, shift = _fold_affine(Cout, p.get("b"), bn)
    scale = jnp.pad(scale, (0, Np - Cout))
    shift = jnp.pad(shift, (0, Np - Cout))
    w_mat = jnp.transpose(w, (2, 3, 1, 0)).reshape(16 * Cin, Cout)
    w_mat = jnp.pad(w_mat, ((0, 0), (0, Np - Cout))).astype(jnp.bfloat16)

    # im2col of the stride-2 4x4 taps (bf16 -> half the traffic of before).
    # TODO(synk): stream taps from the NHWC input inside the kernel (strided
    # pl.ds reads / allow_input_fusion) instead of materializing `cols` in HBM.
    xp = jnp.pad(x, ((0, 0), (1, 1), (1, 1), (0, 0)))
    N, Hp, Wp, _ = xp.shape
    Ho, Wo = (Hp - 4) // 2 + 1, (Wp - 4) // 2 + 1
    taps = [xp[:, i:i + 2 * Ho:2, j:j + 2 * Wo:2, :]
            for i in range(4) for j in range(4)]
    cols = jnp.stack(taps, axis=3).reshape(N * Ho * Wo, 16 * Cin)

    out = fused_matmul(cols.astype(jnp.bfloat16), w_mat, scale, shift,
                       in_act, out_act)
    return out[:, :Cout].reshape(N, Ho, Wo, Cout)


def conv_transpose2d_s2(x, p, bn=None, in_act="none", out_act="none"):
    """PyTorch ConvTranspose2d(Cin, Cout, 4, stride=2, padding=1), NHWC.

    One shared 3x3 im2col over the un-dilated input; the 4 output-parity
    phases are packed into the lane dimension of a single weight matrix
    (zero rows for taps a phase doesn't use), so the whole layer is ONE
    fused matmul pallas_call.
    """
    w = p["w"]                                 # (Cin, Cout, 4, 4)
    Cin, Cout = w.shape[0], w.shape[1]
    N, H, W, _ = x.shape
    Np = _round_up(4 * Cout, 128)
    scale, shift = _fold_affine(Cout, p.get("b"), bn)
    scale4 = jnp.pad(jnp.tile(scale, 4), (0, Np - 4 * Cout))
    shift4 = jnp.pad(jnp.tile(shift, 4), (0, Np - 4 * Cout))

    # Shared 3x3 im2col: a[:, (dy*3+dx)*Cin + ci] = x[m+dy-1, n+dx-1, ci]
    xp = jnp.pad(x, ((0, 0), (1, 1), (1, 1), (0, 0)))
    taps = [xp[:, dy:dy + H, dx:dx + W, :] for dy in range(3) for dx in range(3)]
    a = jnp.stack(taps, axis=3).reshape(N * H * W, 9 * Cin).astype(jnp.bfloat16)

    # Weight: out[2m+py, 2n+px, co] = sum x[m+dy-1, n+dx-1, ci] * w[ci, co, ky, kx]
    # with ky = py + 3 - 2*dy, kx = px + 3 - 2*dx (zero when out of range).
    blocks = []
    for py in range(2):
        for px in range(2):
            rows = []
            for dy in range(3):
                for dx in range(3):
                    ky, kx = py + 3 - 2 * dy, px + 3 - 2 * dx
                    if 0 <= ky <= 3 and 0 <= kx <= 3:
                        rows.append(w[:, :, ky, kx])             # (Cin, Cout)
                    else:
                        rows.append(jnp.zeros((Cin, Cout), w.dtype))
            blocks.append(jnp.concatenate(rows, axis=0))          # (9*Cin, Cout)
    b = jnp.concatenate(blocks, axis=1)                           # (9*Cin, 4*Cout)
    b = jnp.pad(b, ((0, 0), (0, Np - 4 * Cout))).astype(jnp.bfloat16)

    out = fused_matmul(a, b, scale4, shift4, in_act, out_act)     # (M, Np) bf16
    out = out[:, :4 * Cout].reshape(N, H, W, 2, 2, Cout)          # (..., py, px, co)
    out = jnp.transpose(out, (0, 1, 3, 2, 4, 5)).reshape(N, 2 * H, 2 * W, Cout)
    return out


# ---------------- deterministic parameter construction ----------------

def _conv_p(key, cin, cout, bias):
    k1, k2 = jax.random.split(key)
    p = {"w": 0.02 * jax.random.normal(k1, (cout, cin, 4, 4), jnp.float32)}
    if bias:
        p["b"] = 0.02 * jax.random.normal(k2, (cout,), jnp.float32)
    return p


def _convT_p(key, cin, cout, bias):
    k1, k2 = jax.random.split(key)
    p = {"w": 0.02 * jax.random.normal(k1, (cin, cout, 4, 4), jnp.float32)}
    if bias:
        p["b"] = 0.02 * jax.random.normal(k2, (cout,), jnp.float32)
    return p


def _bn_p(key, c):
    k1, k2, k3 = jax.random.split(key, 3)
    return {"gamma": 1.0 + 0.1 * jax.random.normal(k1, (c,), jnp.float32),
            "beta": 0.1 * jax.random.normal(k2, (c,), jnp.float32),
            "mean": 0.1 * jax.random.normal(k3, (c,), jnp.float32),
            "var": jnp.ones((c,), jnp.float32)}


def make_unet_params(key, input_nc, output_nc, num_downs, ngf):
    """Mirrors pix2pix-style UnetSkipConnectionBlock parameterization."""
    keys = iter(jax.random.split(key, 8 * (num_downs + 4)))

    def nk():
        return next(keys)

    def block(outer_nc, inner_nc, input_nc=None, submodule=None,
              outermost=False, innermost=False):
        if input_nc is None:
            input_nc = outer_nc
        p = {"outermost": outermost, "innermost": innermost,
             "submodule": submodule}
        # use_bias=False because norm_layer is BatchNorm2d
        p["downconv"] = _conv_p(nk(), input_nc, inner_nc, bias=False)
        if outermost:
            p["upconv"] = _convT_p(nk(), inner_nc * 2, outer_nc, bias=True)
        elif innermost:
            p["upconv"] = _convT_p(nk(), inner_nc, outer_nc, bias=False)
            p["upnorm"] = _bn_p(nk(), outer_nc)
        else:
            p["downnorm"] = _bn_p(nk(), inner_nc)
            p["upconv"] = _convT_p(nk(), inner_nc * 2, outer_nc, bias=False)
            p["upnorm"] = _bn_p(nk(), outer_nc)
        return p

    b = block(ngf * 8, ngf * 8, innermost=True)
    for _ in range(num_downs - 5):
        b = block(ngf * 8, ngf * 8, submodule=b)
    b = block(ngf * 4, ngf * 8, submodule=b)
    b = block(ngf * 2, ngf * 4, submodule=b)
    b = block(ngf, ngf * 2, submodule=b)
    b = block(output_nc, ngf, input_nc=input_nc, submodule=b, outermost=True)
    return b


def unet_block_forward(p, x):
    # Pre-activations (LeakyReLU / ReLU), BatchNorm and the final tanh are all
    # fused into the conv kernels' prologue/epilogue; no standalone activation
    # passes remain.  All inter-layer activations are bf16.
    # TODO(synk): fuse the spatial<=4x4 inner levels into one resident-weights
    # pallas_call to remove their launch/XLA-glue overhead.
    if p["outermost"]:
        h = conv2d_s2(x, p["downconv"])
        h = unet_block_forward(p["submodule"], h)
        return conv_transpose2d_s2(h, p["upconv"], in_act="relu", out_act="tanh")
    elif p["innermost"]:
        h = conv2d_s2(x, p["downconv"], in_act="leaky_relu")
        h = conv_transpose2d_s2(h, p["upconv"], bn=p["upnorm"], in_act="relu")
        return jnp.concatenate([x, h], axis=-1)
    else:
        h = conv2d_s2(x, p["downconv"], bn=p["downnorm"], in_act="leaky_relu")
        h = unet_block_forward(p["submodule"], h)
        h = conv_transpose2d_s2(h, p["upconv"], bn=p["upnorm"], in_act="relu")
        return jnp.concatenate([x, h], axis=-1)


# ---------------- Feature2Face_G wrapper ----------------

class Feature2FaceG:
    def __init__(self, key, size="normal", n_downsample_G=5, ngf=4, fp16=False):
        if size == "small":
            input_nc = 23
        elif size == "normal":
            input_nc = 3 + 12 + 3
        elif size == "large":
            input_nc = 13
        else:
            raise ValueError(size)
        # TODO(synk): torch.cuda.amp.autocast fp16 path not implemented;
        # bf16 MXU operands / bf16 activations with f32 accumulation are used.
        self.fp16 = fp16
        self.params = make_unet_params(key, input_nc, 3, n_downsample_G, ngf)
        self._fwd = jax.jit(self._forward)

    def _forward(self, x_nchw):
        # accept NCHW like the PyTorch module, run NHWC / bf16 internally
        x = jnp.transpose(x_nchw, (0, 2, 3, 1)).astype(jnp.bfloat16)
        y = unet_block_forward(self.params, x)
        return jnp.transpose(y, (0, 3, 1, 2)).astype(jnp.float32)

    def __call__(self, x_nchw):
        return self._fwd(x_nchw)


# ---------------- golden references (numerical validation) ----------------

def _conv_ref(x_nhwc, w_oihw, bias):
    wf = jnp.transpose(w_oihw, (2, 3, 1, 0))                      # HWIO
    y = jax.lax.conv_general_dilated(
        x_nhwc, wf, window_strides=(2, 2), padding=((1, 1), (1, 1)),
        dimension_numbers=("NHWC", "HWIO", "NHWC"),
        precision=jax.lax.Precision.HIGHEST)
    return y + bias


def _convT_ref(x_nhwc, w_iohw, bias):
    wf = jnp.transpose(w_iohw[:, :, ::-1, ::-1], (2, 3, 0, 1))     # flip -> HWIO
    y = jax.lax.conv_general_dilated(
        x_nhwc, wf, window_strides=(1, 1), padding=((2, 2), (2, 2)),
        lhs_dilation=(2, 2), dimension_numbers=("NHWC", "HWIO", "NHWC"),
        precision=jax.lax.Precision.HIGHEST)
    return y + bias


if __name__ == "__main__":
    key = jax.random.PRNGKey(0)
    kp, kx, kc1, kc2, kx1, kx2 = jax.random.split(key, 6)

    # ---- golden check: Conv2d(6 -> 5, 4, s=2, p=1) ----
    xc = jax.random.normal(kx1, (2, 8, 8, 6), jnp.float32).astype(jnp.bfloat16)
    pc = _conv_p(kc1, 6, 5, bias=True)
    got = conv2d_s2(xc, pc).astype(jnp.float32)
    w32 = pc["w"].astype(jnp.bfloat16).astype(jnp.float32)
    ref = _conv_ref(xc.astype(jnp.float32), w32, pc["b"])
    err = float(jnp.max(jnp.abs(got - ref)))
    assert got.shape == (2, 4, 4, 5) and err < 3e-2, (got.shape, err)

    # ---- golden check: ConvTranspose2d(8 -> 3, 4, s=2, p=1) ----
    xt = jax.random.normal(kx2, (2, 5, 5, 8), jnp.float32).astype(jnp.bfloat16)
    pt = _convT_p(kc2, 8, 3, bias=True)
    got_t = conv_transpose2d_s2(xt, pt).astype(jnp.float32)
    wt32 = pt["w"].astype(jnp.bfloat16).astype(jnp.float32)
    ref_t = _convT_ref(xt.astype(jnp.float32), wt32, pt["b"])
    err_t = float(jnp.max(jnp.abs(got_t - ref_t)))
    assert got_t.shape == (2, 10, 10, 3) and err_t < 3e-2, (got_t.shape, err_t)

    # ---- full model: size='normal' -> input_nc = 3+12+3 = 18, ngf=4, 5 downs ----
    model = Feature2FaceG(kp, size="normal", n_downsample_G=5, ngf=4)
    x = jax.random.normal(kx, (2, 18, 32, 32), jnp.float32)        # NCHW, like PyTorch
    out = model(x)
    out = jax.block_until_ready(out)
    assert out.shape == (2, 3, 32, 32), out.shape
    assert bool(jnp.all(jnp.isfinite(out)))
    print("KERNEL_OK")
</pallas_src>

<mosaic_0001>
module attributes {stable_mosaic.version = 11 : i64} {
  func.func @_fused_matmul_kernel(%arg0: i32, %arg1: i32, %arg2: memref<32x96xbf16, #tpu.memory_space<vmem>>, %arg3: memref<96x128xbf16, #tpu.memory_space<vmem>>, %arg4: memref<1x128xf32, #tpu.memory_space<vmem>>, %arg5: memref<1x128xf32, #tpu.memory_space<vmem>>, %arg6: memref<32x128xbf16, #tpu.memory_space<vmem>>) attributes {dimension_semantics = [#tpu.dimension_semantics<parallel>, #tpu.dimension_semantics<parallel>], iteration_bounds = array<i64: 1, 1>, scalar_prefetch = 0 : i64, scratch_operands = 0 : i64, tpu.core_type = #tpu.core_type<tc>, window_params = [{transform_indices = @transform_0, window_bounds = array<i64: 32, 96>}, {transform_indices = @transform_1, window_bounds = array<i64: 96, 128>}, {transform_indices = @transform_2, window_bounds = array<i64: 1, 128>}, {transform_indices = @transform_3, window_bounds = array<i64: 1, 128>}, {transform_indices = @transform_4, window_bounds = array<i64: 32, 128>}]} {
    %c0 = arith.constant 0 : index
    %c0_0 = arith.constant 0 : index
    %0 = vector.load %arg2[%c0, %c0_0] : memref<32x96xbf16, #tpu.memory_space<vmem>>, vector<32x96xbf16>
    %c0_1 = arith.constant 0 : index
    %c0_2 = arith.constant 0 : index
    %1 = vector.load %arg3[%c0_1, %c0_2] : memref<96x128xbf16, #tpu.memory_space<vmem>>, vector<96x128xbf16>
    %cst = arith.constant dense<0.000000e+00> : vector<32x128xf32>
    %2 = tpu.matmul %0, %1, %cst {dimension_numbers = #tpu.dot_dimension_numbers<[1], [0], [0], [1], [0, 0, 1, 1], [], []>} : vector<32x96xbf16>, vector<96x128xbf16>, vector<32x128xf32> -> vector<32x128xf32>
    %c0_3 = arith.constant 0 : index
    %c0_4 = arith.constant 0 : index
    %3 = vector.load %arg4[%c0_3, %c0_4] : memref<1x128xf32, #tpu.memory_space<vmem>>, vector<1x128xf32>
    %4 = vector.broadcast %3 : vector<1x128xf32> to vector<32x128xf32>
    %5 = arith.mulf %2, %4 : vector<32x128xf32>
    %c0_5 = arith.constant 0 : index
    %c0_6 = arith.constant 0 : index
    %6 = vector.load %arg5[%c0_5, %c0_6] : memref<1x128xf32, #tpu.memory_space<vmem>>, vector<1x128xf32>
    %7 = vector.broadcast %6 : vector<1x128xf32> to vector<32x128xf32>
    %8 = arith.addf %5, %7 : vector<32x128xf32>
    %9 = arith.truncf %8 : vector<32x128xf32> to vector<32x128xbf16>
    %c0_7 = arith.constant 0 : index
    %c0_8 = arith.constant 0 : index
    %10 = vector.load %arg6[%c0_7, %c0_8] : memref<32x128xbf16, #tpu.memory_space<vmem>>, vector<32x128xbf16>
    tpu.vector_store %arg6[%c0_7, %c0_8], %9 {strides = array<i32>} : memref<32x128xbf16, #tpu.memory_space<vmem>>, vector<32x128xbf16>,
    return
  }
  func.func @transform_0(%arg0: i32, %arg1: i32) -> (i32, i32) {
    %c0_i32 = arith.constant 0 : i32
    %c0_i32_0 = arith.constant 0 : i32
    return %arg0, %c0_i32 : i32, i32
  }
  func.func @transform_1(%arg0: i32, %arg1: i32) -> (i32, i32) {
    %c0_i32 = arith.constant 0 : i32
    %c0_i32_0 = arith.constant 0 : i32
    return %c0_i32, %arg1 : i32, i32
  }
  func.func @transform_2(%arg0: i32, %arg1: i32) -> (i32, i32) {
    %c0_i32 = arith.constant 0 : i32
    %c0_i32_0 = arith.constant 0 : i32
    return %c0_i32, %arg1 : i32, i32
  }
  func.func @transform_3(%arg0: i32, %arg1: i32) -> (i32, i32) {
    %c0_i32 = arith.constant 0 : i32
    %c0_i32_0 = arith.constant 0 : i32
    return %c0_i32, %arg1 : i32, i32
  }
  func.func @transform_4(%arg0: i32, %arg1: i32) -> (i32, i32) {
    %c0_i32 = arith.constant 0 : i32
    return %arg0, %arg1 : i32, i32
  }
}

</mosaic_0001>

<bundles_post_ra>
// kernel: tpu_custom_call.1
= control target key start
LH: loop header
LB: loop body
LE: loop exit
PB: predicated region body
PF: predicated region fallthrough
CT: control target
= control target key end

     0   :  { %9 = vsyncpa [#allocation3], 0  ;;  %s415_s0 = inlined_call_operand.hbm [shape: bf16[32,96], index: 0, kind: input, shape index: {}]   ;;  %s416_s1 = inlined_call_operand.hbm [shape: bf16[96,128], index: 1, kind: input, shape index: {}]   ;;  %s417_s2 = inlined_call_operand.vmem [shape: f32[1,128], index: 2, kind: input, shape index: {}]   ;;  %s418_s3 = inlined_call_operand.vmem [shape: f32[1,128], index: 3, kind: input, shape index: {}]   ;;  %s419_s4 = inlined_call_operand.hbm [shape: bf16[32,128], index: 4, kind: output, shape index: {}]  }
   0x1   :  { %10 = vsyncpa [#allocation6], 0 }
   0x2   :  { %11 = vsyncpa [#allocation4], 0  ;;  %s359_s15 = smov [#allocation2]  }
   0x3   :  { %s17_s16 = sshll.u32 %s359_s15, 4  ;;  %s18_s16 = int_to_ptr.vmem [resolvable:$true] %s17_s16 }
   0x4   :  { %s301_s17 = scalar_lea.vmem %s18_s16, 256  ;;  %p306_p1 = scmp.lt.s32.totalorder %s18_s16, %s18_s16 }
   0x5   :  { %p302_p0 = scmp.ne.s32.totalorder %s18_s16, %s301_s17  ;;  %p307_p2 = scmp.lt.s32.totalorder %s301_s17, %s301_s17 }
   0x7   :  { %p308_p3 = por %p307_p2, %p306_p1 }
   0x9   :  { %p309_p4 = pnand %p308_p3, %p302_p0 }
   0xb   :  { %312 = shalt.err (!%p309_p4)
}
   0xc   :  { %s360_s18 = smov 64   ;;  %s361_s19 = smov 4  }
   0xd   :  { %23 = dma.hbm_to_vmem [thread:$0]  %s415_s0, 256, %s18_s16, [#allocation3], %s360_s18, %s360_s18, %s361_s19  }
   0xe   :  { %s362_s22 = smov [#allocation5]  }
   0xf   :  { %s29_s23 = sshll.u32 %s362_s22, 4  ;;  %s30_s23 = int_to_ptr.vmem [resolvable:$true] %s29_s23 }
  0x10   :  { %s321_s24 = scalar_lea.vmem %s30_s23, 768  ;;  %p326_p6 = scmp.lt.s32.totalorder %s30_s23, %s30_s23 }
  0x11   :  { %p322_p5 = scmp.ne.s32.totalorder %s30_s23, %s321_s24  ;;  %p327_p7 = scmp.lt.s32.totalorder %s321_s24, %s321_s24 }
  0x13   :  { %p328_p8 = por %p327_p7, %p326_p6 }
  0x15   :  { %p329_p9 = pnand %p328_p8, %p322_p5 }
  0x17   :  { %332 = shalt.err (!%p329_p9)
}
  0x18   :  { %35 = dma.hbm_to_vmem [thread:$0]  %s416_s1, 768, %s30_s23, [#allocation6], %s360_s18, %s360_s18, %s361_s19  }
  0x19   :  { %353 = dma.done.wait [#allocation3], 256  }
  0x1a   :  { %354 = vsyncadd [#allocation3], 4294967040 }
  0x1b   :  { %355 = dma.done.wait [#allocation6], 768  }
  0x1c   :  { %356 = vsyncadd [#allocation6], 4294966528  ;;  %v285_v0 = vld [vmem:[#allocation5 + $0x28] sm:$0xff]   ;;  %v286_v1 = vld [vmem:[#allocation5 + $0x20] sm:$0xff]   ;;  %vm109_vm0 = vcmask 785408   ;;  %s363_s29 = smov [#allocation7]  }
  0x1d   :  { %264 = vmatprep.subr.bf16.mxu0 %v285_v0  ;;  %v287_v2 = vld [vmem:[#allocation5 + $0x18] sm:$0xff]   ;;  %v291_v3 = vld [vmem:[#allocation2] sm:$0xff]   ;;  %v289_v5 = vld [vmem:[#allocation5 + $0x8] sm:$0xff]   ;;  %s212_s30 = sshll.u32 %s363_s29, 4  ;;  %s213_s30 = int_to_ptr.vmem [resolvable:$true] %s212_s30 }
  0x1e   :  { %265 = vmatpush3.bf16.msra.mxu0 %v285_v0  ;;  %v288_v4 = vld [vmem:[#allocation5 + $0x10] sm:$0xff]   ;;  %276 = vmatprep.mubr.msk.bf16.mxu0 %vm109_vm0, %v291_v3  ;;  %v290_v6 = vld [vmem:[#allocation5] sm:$0xff]   ;;  %v292_v7 = vld [vmem:[#allocation2 + $0x8] sm:$0xff]   ;;  %p338_p11 = scmp.lt.s32.totalorder %s213_s30, %s213_s30 }
  0x1f   :  { %266 = vmatprep.subr.bf16.mxu0 %v286_v1  ;;  %v235_v9 = vld [vmem:[%s417_s2] ss:$0 sm:$0xff]  ;;  %s333_s2 = scalar_lea.vmem %s213_s30, 256 }
  0x20   :  { %v236_v12 = vld [vmem:[%s418_s3] ss:$0 sm:$0xff]  ;;  %p334_p10 = scmp.ne.s32.totalorder %s213_s30, %s333_s2  ;;  %p339_p12 = scmp.lt.s32.totalorder %s333_s2, %s333_s2 }
  0x22   :  { %267 = vmatpush3.bf16.msra.mxu0 %v286_v1  ;;  %p340_p13 = por %p339_p12, %p338_p11 }
  0x23   :  { %268 = vmatprep.subr.bf16.mxu0 %v287_v2 }
  0x24   :  { %p341_p0 = pnand %p340_p13, %p334_p10 }
  0x26   :  { %269 = vmatpush3.bf16.msra.mxu0 %v287_v2 }
  0x27   :  { %270 = vmatprep.subr.bf16.mxu0 %v288_v4 }
  0x2a   :  { %271 = vmatpush3.bf16.msra.mxu0 %v288_v4 }
  0x2b   :  { %272 = vmatprep.subr.bf16.mxu0 %v289_v5 }
  0x2e   :  { %273 = vmatpush3.bf16.msra.mxu0 %v289_v5 }
  0x2f   :  { %274 = vmatprep.subr.bf16.mxu0 %v290_v6 }
  0x32   :  { %275 = vmatpush3.bf16.msra.mxu0 %v290_v6 }
  0x35   :  { %277 = vmatmul.mubr.msk.bf16.vlgmr.msra.gmra.mxu0 %vm109_vm0, %v292_v7 }
  0xf5   :  { %v278_v8 = vpop.f32.mrf.mxu0 }
  0xf6   :  { %v174_v11 = vmul.f32 %v278_v8, %v235_v9 }
  0xf7   :  { %v150_v10 = vpop.f32.mrf.mxu0 }
  0xf8   :  { %v172_v14 = vmul.f32 %v235_v9, %v150_v10  ;;  %v185_v17 = vadd.f32 %v236_v12, %v174_v11 }
  0xf9   :  { %v279_v13 = vpop.f32.mrf.mxu0 }
  0xfa   :  { %v175_v15 = vmul.f32 %v279_v13, %v235_v9  ;;  %v183_v20 = vadd.f32 %v236_v12, %v172_v14 }
  0xfb   :  { %v153_v16 = vpop.f32.mrf.mxu0 }
  0xfc   :  { %v186_v18 = vadd.f32 %v236_v12, %v175_v15  ;;  %v173_v19 = vmul.f32 %v235_v9, %v153_v16 }
  0xfe   :  { %v253_v21 = vpack.c.bf16 %v186_v18, %v185_v17  ;;  %v184_v22 = vadd.f32 %v236_v12, %v173_v19 }
 0x100   :  { %255 = vst [vmem:[#allocation7 + $0x8] sm:$0xff] %v253_v21   ;;  %v248_v23 = vpack.c.bf16 %v184_v22, %v183_v20 }
 0x102   :  { %249 = vst [vmem:[#allocation7] sm:$0xff] %v248_v23  }
 0x103   :  { %344 = shalt.err (!%p341_p0)
}
 0x104   :  { %218 = dma.vmem_to_hbm [thread:$0]  %s213_s30, 256, %s419_s4, [#allocation4], %s360_s18, %s360_s18, %s361_s19  }
 0x105   :  { %357 = dma.done.wait [#allocation4], 256  }
 0x106   :  { %358 = vsyncadd [#allocation4], 4294967040 }
 0x107   :  { %222 = vsyncpa [#allocation3], 1 }
 0x108   :  { %223 = vsyncpa [#allocation6], 1 }
 0x109   :  { %224 = vsyncpa [#allocation4], 1 }

</bundles_post_ra>
